<compile_context>
chip_gen: v7x
topology: tpu7x:2x2x1
jax: 0.10.0
libtpu: 0.0.40
codegen_flags: <defaults>
</compile_context>

<pallas_src>
import functools

import jax
import jax.numpy as jnp
from jax.experimental import pallas as pl
from jax.experimental.pallas import tpu as pltpu

N_INPUTS = 4
N_ACTIONS = 2
H1, H2, H3 = 64, 128, 64
OUT_LANES = 128            # packed output slab: trunk 0:64, logits 64:66, value 66
DEFAULT_BLOCK_B = 1024     # rows per grid step (sweepable; multiple of 8)


def actor_critic_kernel(x_ref, w1_ref, b1_ref, w2_ref, b2_ref, w3_ref, b3_ref,
                        wh_ref, bh_ref, out_ref):
    x = x_ref[...]    # (TB, 4)  f32
    w1 = w1_ref[...]  # (4, 64)  f32

    # linear1 + relu: the K=4 contraction as broadcast multiply-adds on the VPU
    # (no zero-padded MXU matmul, no per-call input padding), kept in f32.
    # TODO(synk): if the bundle dump shows the XLU lane-broadcasts binding after
    # the bf16 matmuls, revert this to a single jnp.dot(x, w1) on the idle MXU.
    h = x[:, 0:1] * w1[0:1, :]
    h = h + x[:, 1:2] * w1[1:2, :]
    h = h + x[:, 2:3] * w1[2:3, :]
    h = h + x[:, 3:4] * w1[3:4, :]
    h = jnp.maximum(h + b1_ref[...], 0.0)                       # (TB, 64) f32

    # linear2 + relu, linear3 + relu: bf16 MXU inputs, f32 accumulation;
    # bias add / ReLU stay in f32.
    h = jnp.maximum(
        jnp.dot(h.astype(jnp.bfloat16), w2_ref[...],
                preferred_element_type=jnp.float32) + b2_ref[...], 0.0)  # (TB,128)
    h = jnp.maximum(
        jnp.dot(h.astype(jnp.bfloat16), w3_ref[...],
                preferred_element_type=jnp.float32) + b3_ref[...], 0.0)  # (TB,64)

    # Packed lane-dense output: wh = [ I_64 | wa | wc | 0 ]  (64, 128), f32.
    # One MXU pass writes trunk (exact pass-through) + actor logits + value
    # into a single dense (TB, 128) slab -> one unmasked store / one DMA.
    out_ref[...] = (
        jnp.dot(h, wh_ref[...], preferred_element_type=jnp.float32) + bh_ref[...])


def _round_up(v, m):
    return ((v + m - 1) // m) * m


def _choose_blocks(batch, block_b):
    """Rows-per-block (multiple of 8) and block count; keep the block count
    even when > 1 so the "parallel" axis balances across v7x's 2 TCs."""
    n = max(1, -(-batch // block_b))
    if n == 1 and batch >= 512:
        n = 2                       # give v7x's second TensorCore work
    if n > 1 and n % 2 == 1:
        n += 1
    tb = _round_up(-(-batch // n), 8)
    return tb, n


@functools.partial(jax.jit, static_argnames=("block_b",))
def actor_critic_forward(x, params, block_b=DEFAULT_BLOCK_B):
    """Returns (trunk_features [B,64], actor_logits [B,2], state_value [B,1])."""
    w1, b1, w2, b2, w3, b3, wh, bh = params
    B = x.shape[0]
    tb, n_blocks = _choose_blocks(B, block_b)
    b_pad = tb * n_blocks
    if b_pad != B:
        x = jnp.pad(x, ((0, b_pad - B), (0, 0)))

    def batch_spec(cols):
        # tiled along batch; one block of `tb` rows per grid step
        return pl.BlockSpec((tb, cols), lambda i: (i, 0))

    def resident_spec(arr):
        # whole array, constant block index -> stays VMEM-resident across steps
        return pl.BlockSpec(arr.shape, lambda i: (0, 0))

    flops = 2 * b_pad * (N_INPUTS * H1 + H1 * H2 + H2 * H3 + H3 * OUT_LANES)
    weight_bytes = sum(int(a.size) * a.dtype.itemsize
                       for a in (w1, b1, w2, b2, w3, b3, wh, bh))
    bytes_accessed = b_pad * N_INPUTS * 4 + b_pad * OUT_LANES * 4 + weight_bytes

    packed = pl.pallas_call(
        actor_critic_kernel,
        grid=(n_blocks,),
        out_shape=jax.ShapeDtypeStruct((b_pad, OUT_LANES), jnp.float32),
        in_specs=[
            batch_spec(N_INPUTS),
            resident_spec(w1), resident_spec(b1),
            resident_spec(w2), resident_spec(b2),
            resident_spec(w3), resident_spec(b3),
            resident_spec(wh), resident_spec(bh),
        ],
        out_specs=batch_spec(OUT_LANES),
        compiler_params=pltpu.CompilerParams(
            dimension_semantics=("parallel",)),
        cost_estimate=pl.CostEstimate(
            flops=flops, transcendentals=0, bytes_accessed=bytes_accessed),
    )(x, w1, b1, w2, b2, w3, b3, wh, bh)

    trunk = packed[:B, :H3]
    logits = packed[:B, H3:H3 + N_ACTIONS]
    value = packed[:B, H3 + N_ACTIONS:H3 + N_ACTIONS + 1]
    return trunk, logits, value


def init_params(key):
    """PyTorch-default-like init: U(-1/sqrt(fan_in), 1/sqrt(fan_in)).
    Weights stored [in, out]; w2/w3 pre-cast to bf16 once; actor/critic heads
    fused with an identity pass-through into one lane-dense (64,128) matrix."""
    def linear(k, fan_in, fan_out, w_dtype=jnp.float32):
        kw, kb = jax.random.split(k)
        bound = 1.0 / jnp.sqrt(float(fan_in))
        w = jax.random.uniform(kw, (fan_in, fan_out), jnp.float32, -bound, bound)
        b = jax.random.uniform(kb, (1, fan_out), jnp.float32, -bound, bound)
        return w.astype(w_dtype), b     # biases stay f32 (added post-accumulate)

    k1, k2, k3, k4, k5 = jax.random.split(key, 5)
    w1, b1 = linear(k1, N_INPUTS, H1)
    w2, b2 = linear(k2, H1, H2, jnp.bfloat16)
    w3, b3 = linear(k3, H2, H3, jnp.bfloat16)
    wa, ba = linear(k4, H3, N_ACTIONS)
    wc, bc = linear(k5, H3, 1)

    # Fused head: [ I_64 | wa | wc | zero-pad ]  -> (64, 128) f32 + (1, 128) bias.
    wh = jnp.zeros((H3, OUT_LANES), jnp.float32)
    wh = wh.at[:, :H3].set(jnp.eye(H3, dtype=jnp.float32))
    wh = wh.at[:, H3:H3 + N_ACTIONS].set(wa)
    wh = wh.at[:, H3 + N_ACTIONS:H3 + N_ACTIONS + 1].set(wc)
    bh = jnp.zeros((1, OUT_LANES), jnp.float32)
    bh = bh.at[:, H3:H3 + N_ACTIONS].set(ba)
    bh = bh.at[:, H3 + N_ACTIONS:H3 + N_ACTIONS + 1].set(bc)
    return (w1, b1, w2, b2, w3, b3, wh, bh)


def reference_forward(x, params):
    # Pure-JAX reference mirroring the kernel's math (same op order, same
    # bf16-input / f32-accumulate dots).
    w1, b1, w2, b2, w3, b3, wh, bh = params
    h = x[:, 0:1] * w1[0:1, :]
    h = h + x[:, 1:2] * w1[1:2, :]
    h = h + x[:, 2:3] * w1[2:3, :]
    h = h + x[:, 3:4] * w1[3:4, :]
    h = jnp.maximum(h + b1, 0.0)
    h = jnp.maximum(jnp.dot(h.astype(jnp.bfloat16), w2,
                            preferred_element_type=jnp.float32) + b2, 0.0)
    h = jnp.maximum(jnp.dot(h.astype(jnp.bfloat16), w3,
                            preferred_element_type=jnp.float32) + b3, 0.0)
    out = jnp.dot(h, wh, preferred_element_type=jnp.float32) + bh
    return h, out[:, H3:H3 + N_ACTIONS], out[:, H3 + N_ACTIONS:H3 + N_ACTIONS + 1]


if __name__ == "__main__":
    key = jax.random.PRNGKey(0)
    kp, kx, kx2 = jax.random.split(key, 3)
    params = init_params(kp)

    # Small batch (latency-bound regime; single grid step).
    B = 8
    x = jax.random.normal(kx, (B, N_INPUTS), jnp.float32)
    trunk, logits, value = jax.block_until_ready(actor_critic_forward(x, params))
    r_trunk, r_logits, r_value = reference_forward(x, params)
    assert trunk.shape == (B, H3)
    assert logits.shape == (B, N_ACTIONS)
    assert value.shape == (B, 1)
    assert jnp.allclose(trunk, r_trunk, atol=2e-2, rtol=2e-2)
    assert jnp.allclose(logits, r_logits, atol=2e-2, rtol=2e-2)
    assert jnp.allclose(value, r_value, atol=2e-2, rtol=2e-2)

    # get_action_probs equivalent (softmax stays outside the kernel).
    probs = jax.nn.softmax(logits, axis=-1)
    assert jnp.allclose(probs.sum(-1), 1.0, atol=1e-5)

    # Larger batch: exercises batch tiling, VMEM-resident weights, remainder
    # padding and the even-block heuristic (1500 rows -> 2 blocks of 752).
    B2 = 1500
    x2 = jax.random.normal(kx2, (B2, N_INPUTS), jnp.float32)
    trunk2, logits2, value2 = jax.block_until_ready(actor_critic_forward(x2, params))
    r_trunk2, r_logits2, r_value2 = reference_forward(x2, params)
    assert trunk2.shape == (B2, H3)
    assert jnp.allclose(trunk2, r_trunk2, atol=2e-2, rtol=2e-2)
    assert jnp.allclose(logits2, r_logits2, atol=2e-2, rtol=2e-2)
    assert jnp.allclose(value2, r_value2, atol=2e-2, rtol=2e-2)

    print("KERNEL_OK")
</pallas_src>

<mosaic_0001>
module attributes {stable_mosaic.version = 11 : i64} {
  func.func @actor_critic_kernel(%arg0: i32, %arg1: memref<8x4xf32, #tpu.memory_space<vmem>>, %arg2: memref<4x64xf32, #tpu.memory_space<vmem>>, %arg3: memref<1x64xf32, #tpu.memory_space<vmem>>, %arg4: memref<64x128xbf16, #tpu.memory_space<vmem>>, %arg5: memref<1x128xf32, #tpu.memory_space<vmem>>, %arg6: memref<128x64xbf16, #tpu.memory_space<vmem>>, %arg7: memref<1x64xf32, #tpu.memory_space<vmem>>, %arg8: memref<64x128xf32, #tpu.memory_space<vmem>>, %arg9: memref<1x128xf32, #tpu.memory_space<vmem>>, %arg10: memref<8x128xf32, #tpu.memory_space<vmem>>) attributes {dimension_semantics = [#tpu.dimension_semantics<parallel>], iteration_bounds = array<i64: 1>, scalar_prefetch = 0 : i64, scratch_operands = 0 : i64, tpu.core_type = #tpu.core_type<tc>, window_params = [{transform_indices = @transform_0, window_bounds = array<i64: 8, 4>}, {pipeline_mode = #tpu.pipeline_mode<synchronous>, transform_indices = @transform_1, window_bounds = array<i64: 4, 64>}, {pipeline_mode = #tpu.pipeline_mode<synchronous>, transform_indices = @transform_2, window_bounds = array<i64: 1, 64>}, {pipeline_mode = #tpu.pipeline_mode<synchronous>, transform_indices = @transform_3, window_bounds = array<i64: 64, 128>}, {pipeline_mode = #tpu.pipeline_mode<synchronous>, transform_indices = @transform_4, window_bounds = array<i64: 1, 128>}, {pipeline_mode = #tpu.pipeline_mode<synchronous>, transform_indices = @transform_5, window_bounds = array<i64: 128, 64>}, {pipeline_mode = #tpu.pipeline_mode<synchronous>, transform_indices = @transform_6, window_bounds = array<i64: 1, 64>}, {pipeline_mode = #tpu.pipeline_mode<synchronous>, transform_indices = @transform_7, window_bounds = array<i64: 64, 128>}, {pipeline_mode = #tpu.pipeline_mode<synchronous>, transform_indices = @transform_8, window_bounds = array<i64: 1, 128>}, {transform_indices = @transform_9, window_bounds = array<i64: 8, 128>}]} {
    %c0 = arith.constant 0 : index
    %c0_0 = arith.constant 0 : index
    %0 = vector.load %arg1[%c0, %c0_0] : memref<8x4xf32, #tpu.memory_space<vmem>>, vector<8x4xf32>
    %c0_1 = arith.constant 0 : index
    %c0_2 = arith.constant 0 : index
    %1 = vector.load %arg2[%c0_1, %c0_2] : memref<4x64xf32, #tpu.memory_space<vmem>>, vector<4x64xf32>
    %2 = vector.extract_strided_slice %0 {offsets = [0, 0], sizes = [8, 1], strides = [1, 1]} : vector<8x4xf32> to vector<8x1xf32>
    %3 = vector.extract_strided_slice %1 {offsets = [0, 0], sizes = [1, 64], strides = [1, 1]} : vector<4x64xf32> to vector<1x64xf32>
    %4 = vector.broadcast %2 : vector<8x1xf32> to vector<8x64xf32>
    %5 = vector.broadcast %3 : vector<1x64xf32> to vector<8x64xf32>
    %6 = arith.mulf %4, %5 : vector<8x64xf32>
    %7 = vector.extract_strided_slice %0 {offsets = [0, 1], sizes = [8, 1], strides = [1, 1]} : vector<8x4xf32> to vector<8x1xf32>
    %8 = vector.extract_strided_slice %1 {offsets = [1, 0], sizes = [1, 64], strides = [1, 1]} : vector<4x64xf32> to vector<1x64xf32>
    %9 = vector.broadcast %7 : vector<8x1xf32> to vector<8x64xf32>
    %10 = vector.broadcast %8 : vector<1x64xf32> to vector<8x64xf32>
    %11 = arith.mulf %9, %10 : vector<8x64xf32>
    %12 = arith.addf %6, %11 : vector<8x64xf32>
    %13 = vector.extract_strided_slice %0 {offsets = [0, 2], sizes = [8, 1], strides = [1, 1]} : vector<8x4xf32> to vector<8x1xf32>
    %14 = vector.extract_strided_slice %1 {offsets = [2, 0], sizes = [1, 64], strides = [1, 1]} : vector<4x64xf32> to vector<1x64xf32>
    %15 = vector.broadcast %13 : vector<8x1xf32> to vector<8x64xf32>
    %16 = vector.broadcast %14 : vector<1x64xf32> to vector<8x64xf32>
    %17 = arith.mulf %15, %16 : vector<8x64xf32>
    %18 = arith.addf %12, %17 : vector<8x64xf32>
    %19 = vector.extract_strided_slice %0 {offsets = [0, 3], sizes = [8, 1], strides = [1, 1]} : vector<8x4xf32> to vector<8x1xf32>
    %20 = vector.extract_strided_slice %1 {offsets = [3, 0], sizes = [1, 64], strides = [1, 1]} : vector<4x64xf32> to vector<1x64xf32>
    %21 = vector.broadcast %19 : vector<8x1xf32> to vector<8x64xf32>
    %22 = vector.broadcast %20 : vector<1x64xf32> to vector<8x64xf32>
    %23 = arith.mulf %21, %22 : vector<8x64xf32>
    %24 = arith.addf %18, %23 : vector<8x64xf32>
    %c0_3 = arith.constant 0 : index
    %c0_4 = arith.constant 0 : index
    %25 = vector.load %arg3[%c0_3, %c0_4] : memref<1x64xf32, #tpu.memory_space<vmem>>, vector<1x64xf32>
    %26 = vector.broadcast %25 : vector<1x64xf32> to vector<8x64xf32>
    %27 = arith.addf %24, %26 : vector<8x64xf32>
    %cst = arith.constant 0.000000e+00 : f32
    %28 = vector.broadcast %cst : f32 to vector<8x64xf32>
    %29 = arith.maximumf %27, %28 : vector<8x64xf32>
    %30 = arith.truncf %29 : vector<8x64xf32> to vector<8x64xbf16>
    %c0_5 = arith.constant 0 : index
    %c0_6 = arith.constant 0 : index
    %31 = vector.load %arg4[%c0_5, %c0_6] : memref<64x128xbf16, #tpu.memory_space<vmem>>, vector<64x128xbf16>
    %cst_7 = arith.constant dense<0.000000e+00> : vector<8x128xf32>
    %32 = tpu.matmul %30, %31, %cst_7 {dimension_numbers = #tpu.dot_dimension_numbers<[1], [0], [0], [1], [0, 0, 1, 1], [], []>} : vector<8x64xbf16>, vector<64x128xbf16>, vector<8x128xf32> -> vector<8x128xf32>
    %c0_8 = arith.constant 0 : index
    %c0_9 = arith.constant 0 : index
    %33 = vector.load %arg5[%c0_8, %c0_9] : memref<1x128xf32, #tpu.memory_space<vmem>>, vector<1x128xf32>
    %34 = vector.broadcast %33 : vector<1x128xf32> to vector<8x128xf32>
    %35 = arith.addf %32, %34 : vector<8x128xf32>
    %cst_10 = arith.constant 0.000000e+00 : f32
    %36 = vector.broadcast %cst_10 : f32 to vector<8x128xf32>
    %37 = arith.maximumf %35, %36 : vector<8x128xf32>
    %38 = arith.truncf %37 : vector<8x128xf32> to vector<8x128xbf16>
    %c0_11 = arith.constant 0 : index
    %c0_12 = arith.constant 0 : index
    %39 = vector.load %arg6[%c0_11, %c0_12] : memref<128x64xbf16, #tpu.memory_space<vmem>>, vector<128x64xbf16>
    %cst_13 = arith.constant dense<0.000000e+00> : vector<8x64xf32>
    %40 = tpu.matmul %38, %39, %cst_13 {dimension_numbers = #tpu.dot_dimension_numbers<[1], [0], [0], [1], [0, 0, 1, 1], [], []>} : vector<8x128xbf16>, vector<128x64xbf16>, vector<8x64xf32> -> vector<8x64xf32>
    %c0_14 = arith.constant 0 : index
    %c0_15 = arith.constant 0 : index
    %41 = vector.load %arg7[%c0_14, %c0_15] : memref<1x64xf32, #tpu.memory_space<vmem>>, vector<1x64xf32>
    %42 = vector.broadcast %41 : vector<1x64xf32> to vector<8x64xf32>
    %43 = arith.addf %40, %42 : vector<8x64xf32>
    %cst_16 = arith.constant 0.000000e+00 : f32
    %44 = vector.broadcast %cst_16 : f32 to vector<8x64xf32>
    %45 = arith.maximumf %43, %44 : vector<8x64xf32>
    %c0_17 = arith.constant 0 : index
    %c0_18 = arith.constant 0 : index
    %46 = vector.load %arg8[%c0_17, %c0_18] : memref<64x128xf32, #tpu.memory_space<vmem>>, vector<64x128xf32>
    %cst_19 = arith.constant dense<0.000000e+00> : vector<8x128xf32>
    %47 = tpu.matmul %45, %46, %cst_19 {dimension_numbers = #tpu.dot_dimension_numbers<[1], [0], [0], [1], [0, 0, 1, 1], [], []>} : vector<8x64xf32>, vector<64x128xf32>, vector<8x128xf32> -> vector<8x128xf32>
    %c0_20 = arith.constant 0 : index
    %c0_21 = arith.constant 0 : index
    %48 = vector.load %arg9[%c0_20, %c0_21] : memref<1x128xf32, #tpu.memory_space<vmem>>, vector<1x128xf32>
    %49 = vector.broadcast %48 : vector<1x128xf32> to vector<8x128xf32>
    %50 = arith.addf %47, %49 : vector<8x128xf32>
    %c0_22 = arith.constant 0 : index
    %c0_23 = arith.constant 0 : index
    %51 = vector.load %arg10[%c0_22, %c0_23] : memref<8x128xf32, #tpu.memory_space<vmem>>, vector<8x128xf32>
    tpu.vector_store %arg10[%c0_22, %c0_23], %50 {strides = array<i32>} : memref<8x128xf32, #tpu.memory_space<vmem>>, vector<8x128xf32>,
    return
  }
  func.func @transform_0(%arg0: i32) -> (i32, i32) {
    %c0_i32 = arith.constant 0 : i32
    %c0_i32_0 = arith.constant 0 : i32
    return %arg0, %c0_i32 : i32, i32
  }
  func.func @transform_1(%arg0: i32) -> (i32, i32) {
    %c0_i32 = arith.constant 0 : i32
    %c0_i32_0 = arith.constant 0 : i32
    %c0_i32_1 = arith.constant 0 : i32
    return %c0_i32, %c0_i32_0 : i32, i32
  }
  func.func @transform_2(%arg0: i32) -> (i32, i32) {
    %c0_i32 = arith.constant 0 : i32
    %c0_i32_0 = arith.constant 0 : i32
    %c0_i32_1 = arith.constant 0 : i32
    return %c0_i32, %c0_i32_0 : i32, i32
  }
  func.func @transform_3(%arg0: i32) -> (i32, i32) {
    %c0_i32 = arith.constant 0 : i32
    %c0_i32_0 = arith.constant 0 : i32
    %c0_i32_1 = arith.constant 0 : i32
    return %c0_i32, %c0_i32_0 : i32, i32
  }
  func.func @transform_4(%arg0: i32) -> (i32, i32) {
    %c0_i32 = arith.constant 0 : i32
    %c0_i32_0 = arith.constant 0 : i32
    %c0_i32_1 = arith.constant 0 : i32
    return %c0_i32, %c0_i32_0 : i32, i32
  }
  func.func @transform_5(%arg0: i32) -> (i32, i32) {
    %c0_i32 = arith.constant 0 : i32
    %c0_i32_0 = arith.constant 0 : i32
    %c0_i32_1 = arith.constant 0 : i32
    return %c0_i32, %c0_i32_0 : i32, i32
  }
  func.func @transform_6(%arg0: i32) -> (i32, i32) {
    %c0_i32 = arith.constant 0 : i32
    %c0_i32_0 = arith.constant 0 : i32
    %c0_i32_1 = arith.constant 0 : i32
    return %c0_i32, %c0_i32_0 : i32, i32
  }
  func.func @transform_7(%arg0: i32) -> (i32, i32) {
    %c0_i32 = arith.constant 0 : i32
    %c0_i32_0 = arith.constant 0 : i32
    %c0_i32_1 = arith.constant 0 : i32
    return %c0_i32, %c0_i32_0 : i32, i32
  }
  func.func @transform_8(%arg0: i32) -> (i32, i32) {
    %c0_i32 = arith.constant 0 : i32
    %c0_i32_0 = arith.constant 0 : i32
    %c0_i32_1 = arith.constant 0 : i32
    return %c0_i32, %c0_i32_0 : i32, i32
  }
  func.func @transform_9(%arg0: i32) -> (i32, i32) {
    %c0_i32 = arith.constant 0 : i32
    %c0_i32_0 = arith.constant 0 : i32
    return %arg0, %c0_i32 : i32, i32
  }
}

</mosaic_0001>

<bundles_post_ra>
// kernel: actor_critic_forward.1
= control target key start
LH: loop header
LB: loop body
LE: loop exit
PB: predicated region body
PF: predicated region fallthrough
CT: control target
= control target key end

     0   :  { %v503_v0 = vmov 0   ;;  %v504_v2 = vmov 2   ;;  %v505_v3 = vmov 0.0   ;;  %v506_v5 = vmov 1   ;;  %s661_s0 = inlined_call_operand.vmem [shape: f32[8,4], index: 0, kind: input, shape index: {}]   ;;  %s662_s3 = inlined_call_operand.vmem [shape: bf16[64,128], index: 3, kind: input, shape index: {}]   ;;  %s663_s5 = inlined_call_operand.vmem [shape: bf16[128,64], index: 5, kind: input, shape index: {}]   ;;  %s664_s1 = inlined_call_operand.vmem [shape: f32[4,64], index: 1, kind: input, shape index: {}]   ;;  %s665_s2 = inlined_call_operand.vmem [shape: f32[1,64], index: 2, kind: input, shape index: {}]   ;;  %s666_s7 = inlined_call_operand.vmem [shape: f32[64,128], index: 7, kind: input, shape index: {}]   ;;  %s667_s4 = inlined_call_operand.vmem [shape: f32[1,128], index: 4, kind: input, shape index: {}]   ;;  %s668_s6 = inlined_call_operand.vmem [shape: f32[1,64], index: 6, kind: input, shape index: {}]   ;;  %s669_s8 = inlined_call_operand.vmem [shape: f32[1,128], index: 8, kind: input, shape index: {}]   ;;  %s670_s9 = inlined_call_operand.vmem [shape: f32[8,128], index: 9, kind: output, shape index: {}]  }
   0x1   :  { %486 = vset.pattern.permute.xlu0 %v503_v0  ;;  %v33_v1 = vld [vmem:[%s661_s0] sm:$0xff]  ;;  %488 = vset.pattern.permute.xlu1 %v504_v2  ;;  %v507_v6 = vmov 3   ;;  %v492_v7 = vld [vmem:[%s662_s3 + $0x8] sm:$0xff]   ;;  %v493_v8 = vld [vmem:[%s662_s3 + $0x10] sm:$0xff]   ;;  %vm508_vm0 = vmmov 0   ;;  %v40_v16 = vlaneseq  ;;  %vm124_vm1 = vcmask 523264  }
   0x2   :  { %37 = vperm.xlu0 %486, %v33_v1   ;;  %56 = vperm.xlu1 %488, %v33_v1   ;;  %v491_v4 = vld [vmem:[%s662_s3] sm:$0xff]   ;;  %v494_v9 = vld [vmem:[%s662_s3 + $0x18] sm:$0xff]   ;;  %v496_v11 = vld [vmem:[%s663_s5 + $0x8] sm:$0xff]   ;;  %v509_v44 = vmov 0.0|0.0  }
   0x3   :  { %416 = vmatprep.subr.bf16.mxu0 %v505_v3  ;;  %428 = vmatprep.subr.bf16.mxu1 %v505_v3  ;;  %v495_v10 = vld [vmem:[%s663_s5] sm:$0xff]   ;;  %v497_v12 = vld [vmem:[%s663_s5 + $0x10] sm:$0xff]   ;;  %v498_v13 = vld [vmem:[%s663_s5 + $0x18] sm:$0xff]   ;;  %v41_v17 = vshrl.u32 %v40_v16, 7 }
   0x4   :  { %417 = vmatpush3.bf16.msra.mxu0 %v491_v4  ;;  %424 = vmatprep.mubr.msk.bf16.mxu0 %vm508_vm0, %v505_v3  ;;  %v499_v14 = vld [vmem:[%s663_s5 + $0x20] sm:$0xff]   ;;  %v500_v15 = vld [vmem:[%s663_s5 + $0x28] sm:$0xff]   ;;  %v501_v42 = vld [vmem:[%s663_s5 + $0x30] sm:$0xff]  }
   0x5   :  { %418 = vmatprep.subr.bf16.mxu0 %v505_v3  ;;  %444 = vmatprep.mubr.msk.bf16.mxu1 %vm508_vm0, %v505_v3  ;;  %v42_v18 = vsub.s32 0, %v41_v17  ;;  %v51_v19 = vsub.s32 1, %v41_v17  ;;  %v34_v20 = vld [vmem:[%s664_s1] sm:$0xf]  ;;  %v61_v22 = vsub.s32 2, %v41_v17  ;;  %v71_v24 = vsub.s32 3, %v41_v17 }
   0x6   :  { %487 = vset.pattern.permute.xlu0 %v506_v5  ;;  %489 = vset.pattern.permute.xlu1 %v507_v6  ;;  %v375_v37 = vld [vmem:[%s665_s2] ss:$0 sm:$0xff]  ;;  %v502_v43 = vld [vmem:[%s663_s5 + $0x38] sm:$0xff]   ;;  %v283_v46 = vld [vmem:[%s666_s7 + $0x8] sm:$0xff] }
   0x7   :  { %46 = vperm.xlu0 %487, %v33_v1   ;;  %66 = vperm.xlu1 %489, %v33_v1   ;;  %v43_v25 = vrot.slane %v34_v20, %v42_v18  ;;  %v52_v26 = vrot.slane %v34_v20, %v51_v19  ;;  %v62_v27 = vrot.slane %v34_v20, %v61_v22  ;;  %v282_v45 = vld [vmem:[%s666_s7] sm:$0xff]  ;;  %v284_v47 = vld [vmem:[%s666_s7 + $0x10] sm:$0xff]  ;;  %v285_v49 = vld [vmem:[%s666_s7 + $0x18] sm:$0xff] }
   0x8   :  { %419 = vmatpush3.bf16.msra.mxu0 %v492_v7  ;;  %429 = vmatpush3.bf16.msra.mxu1 %v495_v10  ;;  %v72_v28 = vrot.slane %v34_v20, %v71_v24  ;;  %v468_v48 = vpack.c.bf16 %v283_v46, %v282_v45  ;;  %v471_v50 = vpack.c.bf16 %v285_v49, %v284_v47  ;;  %v286_v51 = vld [vmem:[%s666_s7 + $0x20] sm:$0xff]  ;;  %v287_v52 = vld [vmem:[%s666_s7 + $0x28] sm:$0xff]  ;;  %v288_v62 = vld [vmem:[%s666_s7 + $0x30] sm:$0xff] }
   0x9   :  { %420 = vmatprep.subr.bf16.mxu0 %v505_v3  ;;  %430 = vmatprep.subr.bf16.mxu1 %v505_v3  ;;  %v474_v53 = vpack.c.bf16 %v287_v52, %v286_v51  ;;  %v376_v54 = vld [vmem:[%s667_s4] ss:$0 sm:$0xff]  ;;  %v289_v63 = vld [vmem:[%s666_s7 + $0x38] sm:$0xff] }
   0xa   :  { %v477_v0 = vpack.c.bf16 %v289_v63, %v288_v62  ;;  %v382_v1 = vld [vmem:[%s668_s6] ss:$0 sm:$0xff] }
   0xb   :  { %490 = vset.pattern.permute.xlu0 %v507_v6 }
   0xc   :  { %421 = vmatpush3.bf16.msra.mxu0 %v493_v8  ;;  %431 = vmatpush3.bf16.msra.mxu1 %v496_v11  ;;  %v391_v8 = vld [vmem:[%s669_s8] ss:$0 sm:$0xff] }
   0xd   :  { %422 = vmatprep.subr.bf16.mxu0 %v505_v3  ;;  %432 = vmatprep.subr.bf16.mxu1 %v505_v3 }
  0x10   :  { %423 = vmatpush3.bf16.msra.mxu0 %v494_v9  ;;  %433 = vmatpush3.bf16.msra.mxu1 %v497_v12 }
  0x11   :  { %434 = vmatprep.subr.bf16.mxu1 %v505_v3  ;;  %467 = vmatprep.subr.bf16.mxu0 %v509_v44 }
  0x14   :  { %435 = vmatpush3.bf16.msra.mxu1 %v498_v13 }
  0x15   :  { %436 = vmatprep.subr.bf16.mxu1 %v505_v3 }
  0x18   :  { %437 = vmatpush3.bf16.msra.mxu1 %v499_v14 }
  0x19   :  { %438 = vmatprep.subr.bf16.mxu1 %v505_v3 }
  0x1c   :  { %439 = vmatpush3.bf16.msra.mxu1 %v500_v15 }
  0x1d   :  { %440 = vmatprep.subr.bf16.mxu1 %v505_v3 }
  0x20   :  { %441 = vmatpush3.bf16.msra.mxu1 %v501_v42 }
  0x21   :  { %442 = vmatprep.subr.bf16.mxu1 %v505_v3 }
  0x24   :  { %443 = vmatpush3.bf16.msra.mxu1 %v502_v43 }
  0x81   :  { %v38_v21 = vpop.permute.xlu0 %37  ;;  %v57_v23 = vpop.permute.xlu1 %56 }
  0x82   :  { %v44_v31 = vmul.f32 %v43_v25, %v38_v21  ;;  %v63_v33 = vmul.f32 %v62_v27, %v57_v23 }
  0x86   :  { %v47_v29 = vpop.permute.xlu0 %46  ;;  %v67_v30 = vpop.permute.xlu1 %66 }
  0x87   :  { %v53_v32 = vmul.f32 %v52_v26, %v47_v29  ;;  %v73_v35 = vmul.f32 %v72_v28, %v67_v30 }
  0x89   :  { %v54_v34 = vadd.f32 %v53_v32, %v44_v31 }
  0x8b   :  { %v64_v36 = vadd.f32 %v63_v33, %v54_v34 }
  0x8d   :  { %v74_v38 = vadd.f32 %v73_v35, %v64_v36 }
  0x8f   :  { %v82_v39 = vadd.f32 %v375_v37, %v74_v38 }
  0x91   :  { %v83_v40 = vmax.f32 %v82_v39, 0.0 }
  0x93   :  { %v84_v41 = vpack.c.bf16 %v83_v40, %v83_v40 }
  0x95   :  { %425 = vmatmul.mubr.msk.bf16.vlgmr.msra.gmra.mrb[0].mxu0 %vm124_vm1, %v84_v41 }
  0x96   :  { %464 = vmatprep.mubr.msk.f32.mxu0 %vm508_vm0, %v505_v3  ;;  %469 = vmatpush3.bf16.msra.mxu0 %v468_v48 }
  0x97   :  { %470 = vmatprep.subr.bf16.mxu0 %v509_v44 }
  0x9a   :  { %472 = vmatpush3.bf16.msra.mxu0 %v471_v50 }
  0x9b   :  { %473 = vmatprep.subr.bf16.mxu0 %v509_v44 }
  0x9e   :  { %475 = vmatpush3.bf16.msra.mxu0 %v474_v53 }
  0x9f   :  { %476 = vmatprep.subr.bf16.mxu0 %v509_v44 }
  0xa2   :  { %478 = vmatpush3.bf16.msra.mxu0 %v477_v0 }
 0x168   :  { %v162_v55 = vpop.f32.mrb[0].mxu0 }
 0x169   :  { %v163_v56 = vadd.f32 %v376_v54, %v162_v55  ;;  %v426_v57 = vpop.f32.mrb[1].mxu0 }
 0x16a   :  { %v165_v58 = vpop.f32.mrb[2].mxu0 }
 0x16b   :  { %v168_v59 = vmax.f32 %v163_v56, 0.0  ;;  %v427_v60 = vpop.f32.mrb[3].mxu0 }
 0x16d   :  { %v169_v61 = vpack.c.bf16 %v168_v59, %v168_v59 }
 0x16f   :  { %445 = vmatmul.mubr.bf16.vlgmr.msra.gmra.mrb[0].mxu1 %v169_v61 }
 0x242   :  { %v275_v2 = vpop.f32.mrb[0].mxu1 }
 0x243   :  { %v276_v3 = vadd.f32 %v382_v1, %v275_v2  ;;  %v446_v4 = vpop.f32.mrb[1].mxu1 }
 0x244   :  { %v278_v5 = vpop.f32.mrb[2].mxu1 }
 0x245   :  { %v281_v6 = vmax.f32 %v276_v3, 0.0  ;;  %v447_v7 = vpop.f32.mrb[3].mxu1 }
 0x247   :  { %465 = vmatmul.mubr.msk.f32.vlgmr.msra.gmra.mrb[4].mxu0 %vm124_vm1, %v281_v6 }
 0x31a   :  { %v366_v9 = vpop.f32.mrb[4].mxu0 }
 0x31b   :  { %v367_v10 = vadd.f32 %v391_v8, %v366_v9  ;;  %v466_v11 = vpop.f32.mrb[5].mxu0 }
 0x31d   :  { %370 = vst [vmem:[%s670_s9] sm:$0xff] %v367_v10 }

</bundles_post_ra>
